<compile_context>
chip_gen: v7x
topology: tpu7x:2x2x1
jax: 0.10.0
libtpu: 0.0.40
codegen_flags: <defaults>
</compile_context>

<pallas_src>
import functools

import numpy as np
import jax
import jax.numpy as jnp
from jax.experimental import pallas as pl
from jax.experimental.pallas import tpu as pltpu


# ----------------------------------------------------------------------------
# Host-side construction of the banded stencil matrices
# ----------------------------------------------------------------------------

def _band_matrix(taps, n):
    """(n, n) matrix A with (A v)[i] = sum_u taps[u] * v[i + u - 1], zero pad."""
    a = np.zeros((n, n), np.float64)
    for u, t in enumerate(taps):
        if t == 0.0:
            continue
        off = u - 1
        for i in range(n):
            j = i + off
            if 0 <= j < n:
                a[i, j] = t
    return a


def _block_diag(m, g):
    n = m.shape[0]
    out = np.zeros((g * n, g * n), m.dtype)
    for i in range(g):
        out[i * n:(i + 1) * n, i * n:(i + 1) * n] = m
    return out


def _stencil_matrices(h, w, g):
    """Fold avg_pool2d(3,1,1) + both Sobel convs into (L_cat, Rx, Ry).

    L_cat = [[blockdiag(Lx, g)], [blockdiag(Ly, g)]]  : (2*g*h, g*h)
    Rx, Ry                                            : (w, w)
    For a (g*h, w) slab X of g stacked images:
        u  = L_cat @ X       (u[:g*h] = smoothed path, u[g*h:] = diffed path)
        gx = u[:g*h] @ Rx,   gy = u[g*h:] @ Ry
    Returned in bf16 (MXU operands); accumulation stays f32.
    """
    ones3 = (1.0, 1.0, 1.0)          # avg-pool taps (1/9 split as 3 * 3)
    smooth = (0.25, 0.5, 0.25)       # [1, 2, 1] / 4
    diff = (1.0, 0.0, -1.0)          # [1, 0, -1]
    p_h = _band_matrix(ones3, h)     # vertical half of the avg pool
    p_w = _band_matrix(ones3, w)     # horizontal half of the avg pool
    lx = _band_matrix(smooth, h) @ p_h / 3.0            # (h, h)
    ly = _band_matrix(diff, h) @ p_h / 3.0              # (h, h)
    rx = (_band_matrix(diff, w) @ p_w / 3.0).T          # (w, w)
    ry = (_band_matrix(smooth, w) @ p_w / 3.0).T        # (w, w)
    l_cat = np.concatenate([_block_diag(lx, g), _block_diag(ly, g)], axis=0)
    return (jnp.asarray(l_cat, jnp.bfloat16),
            jnp.asarray(rx, jnp.bfloat16),
            jnp.asarray(ry, jnp.bfloat16))


# ----------------------------------------------------------------------------
# Pallas kernel: G images per grid step, fully fused, 3 MXU matmuls
# ----------------------------------------------------------------------------

def _sobel_kernel(x_ref, l_ref, rx_ref, ry_ref, o_ref, *, gh, epsilon):
    # (G*H, W) slab of G stacked images; bf16 MXU operands, f32 accumulate.
    xs = x_ref[...].astype(jnp.bfloat16)
    u = jnp.dot(l_ref[...], xs, preferred_element_type=jnp.float32)   # (2GH, W)
    u = u.astype(jnp.bfloat16)
    # Sublane-aligned splits (gh is a multiple of 8) -> no lane relayout.
    gx = jnp.dot(u[:gh], rx_ref[...], preferred_element_type=jnp.float32)
    gy = jnp.dot(u[gh:], ry_ref[...], preferred_element_type=jnp.float32)
    o_ref[...] = jnp.sqrt(gx * gx + gy * gy + epsilon).astype(o_ref.dtype)


def _choose_group(bc, h, w, itemsize):
    """Images per grid step.  Prefer G*H >= 128 (MXU rows / sublane density),
    then >= 2 grid steps (v7x has 2 TensorCores), then the smallest such G
    (the stacked-left matmul carries a factor-G block-diagonal redundancy)."""
    best, best_key = 1, None
    for g in range(1, bc + 1):
        if bc % g:
            continue
        gh = g * h
        if (gh % 8 != 0) and g != bc:                     # BlockSpec (8,128) rule
            continue
        if g > 1 and g * h * w * itemsize > (2 << 20):    # per-step input block
            continue
        if g > 1 and gh > 1024:                           # keep stacked L small
            continue
        key = (min(gh, 128), (bc // g) >= 2, -g)
        if best_key is None or key > best_key:
            best, best_key = g, key
    return best


def sobel_operator(x, epsilon):
    """Pallas TPU implementation of SobelOperator.forward.  x: (B, C, H, W)."""
    B, C, H, W = x.shape
    BC = B * C
    G = _choose_group(BC, H, W, x.dtype.itemsize)
    GH = G * H
    steps = BC // G

    x_slab = x.reshape(BC * H, W)                  # contiguous view, free in HBM
    l_cat, rx, ry = _stencil_matrices(H, W, G)

    # Advisory cost so XLA schedules surrounding ops against the kernel.
    mm_flops = steps * 2 * ((2 * GH) * GH * W + 2 * GH * W * W)
    cost = pl.CostEstimate(
        flops=int(mm_flops + 10 * BC * H * W),
        transcendentals=int(BC * H * W),
        bytes_accessed=int(2 * BC * H * W * x.dtype.itemsize
                           + 2 * (l_cat.size + rx.size + ry.size)),
    )

    # Resident constants (worst case double-buffered) + double-buffered
    # in/out blocks + f32 temporaries.  Only raise the scoped VMEM limit when
    # the conservative (v5e, 16 MiB) default would not fit; cap at v7x's
    # 64 MiB physical VMEM.
    const_bytes = 2 * (l_cat.size + rx.size + ry.size)       # bf16
    io_bytes = 2 * 2 * GH * W * x.dtype.itemsize
    tmp_bytes = 4 * (2 * GH * W) * 4
    vmem_est = 2 * const_bytes + io_bytes + tmp_bytes
    vmem_limit = None
    if vmem_est > 12 * 1024 * 1024:
        vmem_limit = int(min(2 * vmem_est, 64 * 1024 * 1024))

    out = pl.pallas_call(
        functools.partial(_sobel_kernel, gh=GH, epsilon=float(epsilon)),
        out_shape=jax.ShapeDtypeStruct((BC * H, W), x.dtype),
        grid_spec=pltpu.PrefetchScalarGridSpec(
            num_scalar_prefetch=0,
            grid=(steps,),
            in_specs=[
                pl.BlockSpec((GH, W), lambda i: (i, 0)),        # image slab
                pl.BlockSpec((2 * GH, GH), lambda i: (0, 0)),   # [Lx; Ly] resident
                pl.BlockSpec((W, W), lambda i: (0, 0)),         # Rx resident
                pl.BlockSpec((W, W), lambda i: (0, 0)),         # Ry resident
            ],
            out_specs=pl.BlockSpec((GH, W), lambda i: (i, 0)),
        ),
        compiler_params=pltpu.CompilerParams(
            dimension_semantics=("parallel",),
            vmem_limit_bytes=vmem_limit),
        cost_estimate=cost,
    )(x_slab, l_cat, rx, ry)
    return out.reshape(B, C, H, W)


# ----------------------------------------------------------------------------
# Plain-JAX reference (independent path via lax.conv) for validation
# ----------------------------------------------------------------------------

def _sobel_reference(x, epsilon):
    B, C, H, W = x.shape
    xf = x.reshape(B * C, 1, H, W).astype(jnp.float32)
    k_avg = jnp.full((1, 1, 3, 3), 1.0 / 9.0, jnp.float32)
    k_x = jnp.asarray([[1, 0, -1], [2, 0, -2], [1, 0, -1]],
                      jnp.float32).reshape(1, 1, 3, 3) / 4.0
    k_y = jnp.asarray([[1, 2, 1], [0, 0, 0], [-1, -2, -1]],
                      jnp.float32).reshape(1, 1, 3, 3) / 4.0

    def conv(a, k):
        return jax.lax.conv_general_dilated(
            a, k, window_strides=(1, 1), padding=((1, 1), (1, 1)),
            dimension_numbers=("NCHW", "OIHW", "NCHW"),
            precision=jax.lax.Precision.HIGHEST)

    pooled = conv(xf, k_avg)
    gx = conv(pooled, k_x)
    gy = conv(pooled, k_y)
    return jnp.sqrt(gx * gx + gy * gy + epsilon).reshape(B, C, H, W)


# ----------------------------------------------------------------------------
# Main
# ----------------------------------------------------------------------------

if __name__ == "__main__":
    key = jax.random.PRNGKey(0)
    epsilon = 1e-4

    B, C, H, W = 2, 4, 16, 16
    x = jax.random.normal(key, (B, C, H, W), jnp.float32)

    fwd = jax.jit(functools.partial(sobel_operator, epsilon=epsilon))
    out = jax.block_until_ready(fwd(x))

    assert out.shape == (B, C, H, W)
    assert bool(jnp.all(jnp.isfinite(out)))

    ref = _sobel_reference(x, epsilon)
    # bf16 MXU operands with f32 accumulation: allow bf16-level relative error
    # against the f32 HIGHEST-precision reference.
    err = float(jnp.max(jnp.abs(out - ref) / (1.0 + jnp.abs(ref))))
    assert err < 5e-2, f"error vs reference = {err}"

    print("KERNEL_OK")
</pallas_src>

<mosaic_0001>
module attributes {stable_mosaic.version = 11 : i64} {
  func.func @_sobel_kernel(%arg0: i32, %arg1: memref<128x16xf32, #tpu.memory_space<vmem>>, %arg2: memref<256x128xbf16, #tpu.memory_space<vmem>>, %arg3: memref<16x16xbf16, #tpu.memory_space<vmem>>, %arg4: memref<16x16xbf16, #tpu.memory_space<vmem>>, %arg5: memref<128x16xf32, #tpu.memory_space<vmem>>) attributes {dimension_semantics = [#tpu.dimension_semantics<parallel>], iteration_bounds = array<i64: 1>, scalar_prefetch = 0 : i64, scratch_operands = 0 : i64, tpu.core_type = #tpu.core_type<tc>, window_params = [{transform_indices = @transform_0, window_bounds = array<i64: 128, 16>}, {pipeline_mode = #tpu.pipeline_mode<synchronous>, transform_indices = @transform_1, window_bounds = array<i64: 256, 128>}, {pipeline_mode = #tpu.pipeline_mode<synchronous>, transform_indices = @transform_2, window_bounds = array<i64: 16, 16>}, {pipeline_mode = #tpu.pipeline_mode<synchronous>, transform_indices = @transform_3, window_bounds = array<i64: 16, 16>}, {transform_indices = @transform_4, window_bounds = array<i64: 128, 16>}]} {
    %c0 = arith.constant 0 : index
    %c0_0 = arith.constant 0 : index
    %0 = vector.load %arg1[%c0, %c0_0] : memref<128x16xf32, #tpu.memory_space<vmem>>, vector<128x16xf32>
    %1 = arith.truncf %0 : vector<128x16xf32> to vector<128x16xbf16>
    %c0_1 = arith.constant 0 : index
    %c0_2 = arith.constant 0 : index
    %2 = vector.load %arg2[%c0_1, %c0_2] : memref<256x128xbf16, #tpu.memory_space<vmem>>, vector<256x128xbf16>
    %cst = arith.constant dense<0.000000e+00> : vector<256x16xf32>
    %3 = tpu.matmul %2, %1, %cst {dimension_numbers = #tpu.dot_dimension_numbers<[1], [0], [0], [1], [0, 0, 1, 1], [], []>} : vector<256x128xbf16>, vector<128x16xbf16>, vector<256x16xf32> -> vector<256x16xf32>
    %4 = arith.truncf %3 : vector<256x16xf32> to vector<256x16xbf16>
    %5 = vector.extract_strided_slice %4 {offsets = [0, 0], sizes = [128, 16], strides = [1, 1]} : vector<256x16xbf16> to vector<128x16xbf16>
    %c0_3 = arith.constant 0 : index
    %c0_4 = arith.constant 0 : index
    %6 = vector.load %arg3[%c0_3, %c0_4] : memref<16x16xbf16, #tpu.memory_space<vmem>>, vector<16x16xbf16>
    %cst_5 = arith.constant dense<0.000000e+00> : vector<128x16xf32>
    %7 = tpu.matmul %5, %6, %cst_5 {dimension_numbers = #tpu.dot_dimension_numbers<[1], [0], [0], [1], [0, 0, 1, 1], [], []>} : vector<128x16xbf16>, vector<16x16xbf16>, vector<128x16xf32> -> vector<128x16xf32>
    %8 = vector.extract_strided_slice %4 {offsets = [128, 0], sizes = [128, 16], strides = [1, 1]} : vector<256x16xbf16> to vector<128x16xbf16>
    %c0_6 = arith.constant 0 : index
    %c0_7 = arith.constant 0 : index
    %9 = vector.load %arg4[%c0_6, %c0_7] : memref<16x16xbf16, #tpu.memory_space<vmem>>, vector<16x16xbf16>
    %cst_8 = arith.constant dense<0.000000e+00> : vector<128x16xf32>
    %10 = tpu.matmul %8, %9, %cst_8 {dimension_numbers = #tpu.dot_dimension_numbers<[1], [0], [0], [1], [0, 0, 1, 1], [], []>} : vector<128x16xbf16>, vector<16x16xbf16>, vector<128x16xf32> -> vector<128x16xf32>
    %11 = arith.mulf %7, %7 : vector<128x16xf32>
    %12 = arith.mulf %10, %10 : vector<128x16xf32>
    %13 = arith.addf %11, %12 : vector<128x16xf32>
    %cst_9 = arith.constant 9.99999974E-5 : f32
    %14 = vector.broadcast %cst_9 : f32 to vector<128x16xf32>
    %15 = arith.addf %13, %14 : vector<128x16xf32>
    %16 = math.sqrt %15 : vector<128x16xf32>
    %c0_10 = arith.constant 0 : index
    %c0_11 = arith.constant 0 : index
    %17 = vector.load %arg5[%c0_10, %c0_11] : memref<128x16xf32, #tpu.memory_space<vmem>>, vector<128x16xf32>
    tpu.vector_store %arg5[%c0_10, %c0_11], %16 {strides = array<i32>} : memref<128x16xf32, #tpu.memory_space<vmem>>, vector<128x16xf32>,
    return
  }
  func.func @transform_0(%arg0: i32) -> (i32, i32) {
    %c0_i32 = arith.constant 0 : i32
    %c0_i32_0 = arith.constant 0 : i32
    return %arg0, %c0_i32 : i32, i32
  }
  func.func @transform_1(%arg0: i32) -> (i32, i32) {
    %c0_i32 = arith.constant 0 : i32
    %c0_i32_0 = arith.constant 0 : i32
    %c0_i32_1 = arith.constant 0 : i32
    return %c0_i32, %c0_i32_0 : i32, i32
  }
  func.func @transform_2(%arg0: i32) -> (i32, i32) {
    %c0_i32 = arith.constant 0 : i32
    %c0_i32_0 = arith.constant 0 : i32
    %c0_i32_1 = arith.constant 0 : i32
    return %c0_i32, %c0_i32_0 : i32, i32
  }
  func.func @transform_3(%arg0: i32) -> (i32, i32) {
    %c0_i32 = arith.constant 0 : i32
    %c0_i32_0 = arith.constant 0 : i32
    %c0_i32_1 = arith.constant 0 : i32
    return %c0_i32, %c0_i32_0 : i32, i32
  }
  func.func @transform_4(%arg0: i32) -> (i32, i32) {
    %c0_i32 = arith.constant 0 : i32
    %c0_i32_0 = arith.constant 0 : i32
    return %arg0, %c0_i32 : i32, i32
  }
}

</mosaic_0001>

<bundles_post_ra>
// kernel: sobel_operator.1
= control target key start
LH: loop header
LB: loop body
LE: loop exit
PB: predicated region body
PF: predicated region fallthrough
CT: control target
= control target key end

     0   :  { %9 = vsyncpa [#allocation3], 0  ;;  %s1369_s0 = inlined_call_operand.hbm [shape: f32[128,16], index: 0, kind: input, shape index: {}]   ;;  %s1370_s1 = inlined_call_operand.hbm [shape: bf16[256,128], index: 1, kind: input, shape index: {}]   ;;  %s1371_s2 = inlined_call_operand.vmem [shape: bf16[16,16], index: 2, kind: input, shape index: {}]   ;;  %s1372_s3 = inlined_call_operand.vmem [shape: bf16[16,16], index: 3, kind: input, shape index: {}]   ;;  %s1373_s4 = inlined_call_operand.hbm [shape: f32[128,16], index: 4, kind: output, shape index: {}]  }
   0x1   :  { %10 = vsyncpa [#allocation6], 0 }
   0x2   :  { %11 = vsyncpa [#allocation4], 0  ;;  %s1134_s15 = smov [#allocation2]   ;;  %s1062_s19 = scalar_lea.hbm %s1369_s0, 2048 }
   0x3   :  { %s17_s16 = sshll.u32 %s1134_s15, 4  ;;  %p1063_p0 = scmp.ne.s32.totalorder %s1369_s0, %s1062_s19  ;;  %s18_s16 = int_to_ptr.vmem [resolvable:$true] %s17_s16 }
   0x4   :  { %p1066_p1 = scmp.lt.u32.totalorder %s1062_s19, %s1369_s0 }
   0x6   :  { %p1068_p2 = pnand %p1066_p1, %p1063_p0 }
   0x8   :  { %1071 = shalt.err (!%p1068_p2)
}
   0x9   :  { %s1072_s24 = scalar_lea.vmem %s18_s16, 2048  ;;  %p1077_p4 = scmp.lt.s32.totalorder %s18_s16, %s18_s16 }
   0xa   :  { %p1073_p3 = scmp.ne.s32.totalorder %s18_s16, %s1072_s24  ;;  %p1078_p5 = scmp.lt.s32.totalorder %s1072_s24, %s1072_s24 }
   0xc   :  { %p1079_p6 = por %p1078_p5, %p1077_p4 }
   0xe   :  { %p1080_p7 = pnand %p1079_p6, %p1073_p3 }
  0x10   :  { %1083 = shalt.err (!%p1080_p7)
}
  0x11   :  { %s1135_s25 = smov 128   ;;  %s1136_s26 = smov 8  }
  0x12   :  { %23 = dma.hbm_to_vmem [thread:$0]  %s1369_s0, 2048, %s18_s16, [#allocation3], %s1135_s25, %s1135_s25, %s1136_s26  }
  0x13   :  { %s1137_s29 = smov [#allocation5]   ;;  %s1084_s7 = scalar_lea.hbm %s1370_s1, 2048 }
  0x14   :  { %s29_s30 = sshll.u32 %s1137_s29, 4  ;;  %p1085_p8 = scmp.ne.s32.totalorder %s1370_s1, %s1084_s7  ;;  %s30_s30 = int_to_ptr.vmem [resolvable:$true] %s29_s30 }
  0x15   :  { %p1088_p9 = scmp.lt.u32.totalorder %s1084_s7, %s1370_s1 }
  0x17   :  { %p1090_p10 = pnand %p1088_p9, %p1085_p8 }
  0x19   :  { %1093 = shalt.err (!%p1090_p10)
}
  0x1a   :  { %s1094_s12 = scalar_lea.vmem %s30_s30, 2048  ;;  %p1099_p12 = scmp.lt.s32.totalorder %s30_s30, %s30_s30 }
  0x1b   :  { %p1095_p11 = scmp.ne.s32.totalorder %s30_s30, %s1094_s12  ;;  %p1100_p13 = scmp.lt.s32.totalorder %s1094_s12, %s1094_s12 }
  0x1d   :  { %p1101_p0 = por %p1100_p13, %p1099_p12 }
  0x1f   :  { %p1102_p1 = pnand %p1101_p0, %p1095_p11 }
  0x21   :  { %1105 = shalt.err (!%p1102_p1)
}
  0x22   :  { %s1138_s0 = smov 64   ;;  %s1139_s13 = smov 4  }
  0x23   :  { %35 = dma.hbm_to_vmem [thread:$0]  %s1370_s1, 2048, %s30_s30, [#allocation6], %s1138_s0, %s1138_s0, %s1139_s13  }
  0x24   :  { %1128 = dma.done.wait [#allocation3], 2048  }
  0x25   :  { %1129 = vsyncadd [#allocation3], 4294965248 }
  0x26   :  { %1130 = dma.done.wait [#allocation6], 2048  }
  0x27   :  { %1131 = vsyncadd [#allocation6], 4294965248  ;;  %v47_v0 = vld [vmem:[#allocation2] sm:$0xff]  ;;  %v48_v1 = vld [vmem:[#allocation2 + $0x8] sm:$0xff]  ;;  %vm384_vm0 = vcmask 130048  }
  0x28   :  { %v49_v2 = vld [vmem:[#allocation2 + $0x10] sm:$0xff]  ;;  %v63_v3 = vpack.c.bf16 %v48_v1, %v47_v0  ;;  %v50_v4 = vld [vmem:[#allocation2 + $0x18] sm:$0xff]  ;;  %v51_v6 = vld [vmem:[#allocation2 + $0x20] sm:$0xff] }
  0x29   :  { %v64_v5 = vpack.c.bf16 %v50_v4, %v49_v2  ;;  %v52_v7 = vld [vmem:[#allocation2 + $0x28] sm:$0xff]  ;;  %v53_v8 = vld [vmem:[#allocation2 + $0x30] sm:$0xff]  ;;  %v54_v10 = vld [vmem:[#allocation2 + $0x38] sm:$0xff] }
  0x2a   :  { %921 = vmatprep.subr.bf16.mxu0 %v63_v3  ;;  %v65_v9 = vpack.c.bf16 %v52_v7, %v51_v6  ;;  %v1012_v11 = vld [vmem:[#allocation5] sm:$0xff]   ;;  %v66_v12 = vpack.c.bf16 %v54_v10, %v53_v8  ;;  %v56_v14 = vld [vmem:[#allocation2 + $0x48] sm:$0xff]  ;;  %v57_v16 = vld [vmem:[#allocation2 + $0x50] sm:$0xff] }
  0x2b   :  { %922 = vmatpush3.bf16.msra.mxu0 %v63_v3  ;;  %937 = vmatprep.mubr.bf16.mxu0 %v1012_v11  ;;  %v55_v13 = vld [vmem:[#allocation2 + $0x40] sm:$0xff]  ;;  %v58_v17 = vld [vmem:[#allocation2 + $0x58] sm:$0xff]  ;;  %v60_v20 = vld [vmem:[#allocation2 + $0x68] sm:$0xff] }
  0x2c   :  { %923 = vmatprep.subr.bf16.mxu0 %v64_v5  ;;  %v67_v15 = vpack.c.bf16 %v56_v14, %v55_v13  ;;  %v68_v18 = vpack.c.bf16 %v58_v17, %v57_v16  ;;  %v59_v19 = vld [vmem:[#allocation2 + $0x60] sm:$0xff]  ;;  %v61_v22 = vld [vmem:[#allocation2 + $0x70] sm:$0xff]  ;;  %v62_v23 = vld [vmem:[#allocation2 + $0x78] sm:$0xff] }
  0x2d   :  { %v69_v21 = vpack.c.bf16 %v60_v20, %v59_v19  ;;  %v70_v24 = vpack.c.bf16 %v62_v23, %v61_v22  ;;  %v1013_v25 = vld [vmem:[#allocation5 + $0x8] sm:$0xff]   ;;  %v1014_v26 = vld [vmem:[#allocation5 + $0x10] sm:$0xff]   ;;  %v1015_v27 = vld [vmem:[#allocation5 + $0x18] sm:$0xff]  }
  0x2e   :  { %v1016_v28 = vld [vmem:[#allocation5 + $0x20] sm:$0xff]   ;;  %v1017_v29 = vld [vmem:[#allocation5 + $0x28] sm:$0xff]   ;;  %v1018_v30 = vld [vmem:[#allocation5 + $0x30] sm:$0xff]  }
  0x2f   :  { %924 = vmatpush3.bf16.msra.mxu0 %v64_v5  ;;  %v1019_v31 = vld [vmem:[#allocation5 + $0x38] sm:$0xff]   ;;  %v1020_v32 = vld [vmem:[#allocation5 + $0x40] sm:$0xff]   ;;  %v1021_v33 = vld [vmem:[#allocation5 + $0x48] sm:$0xff]  }
  0x30   :  { %925 = vmatprep.subr.bf16.mxu0 %v65_v9  ;;  %v1022_v34 = vld [vmem:[#allocation5 + $0x50] sm:$0xff]   ;;  %v1023_v35 = vld [vmem:[#allocation5 + $0x58] sm:$0xff]   ;;  %v1024_v36 = vld [vmem:[#allocation5 + $0x60] sm:$0xff]  }
  0x31   :  { %v1025_v37 = vld [vmem:[#allocation5 + $0x68] sm:$0xff]   ;;  %v1026_v38 = vld [vmem:[#allocation5 + $0x70] sm:$0xff]   ;;  %v1027_v39 = vld [vmem:[#allocation5 + $0x78] sm:$0xff]  }
  0x32   :  { %v1028_v40 = vld [vmem:[%s1371_s2] sm:$0xff]   ;;  %s1140_s2 = smov [#allocation7]  }
  0x33   :  { %926 = vmatpush3.bf16.msra.mxu0 %v65_v9  ;;  %969 = vmatprep.subr.bf16.mxu1 %v1028_v40  ;;  %v1029_v41 = vld [vmem:[%s1372_s3] sm:$0xff]   ;;  %s832_s3 = sshll.u32 %s1140_s2, 4  ;;  %s833_s3 = int_to_ptr.vmem [resolvable:$true] %s832_s3 }
  0x34   :  { %927 = vmatprep.subr.bf16.mxu0 %v66_v12  ;;  %970 = vmatpush3.bf16.msra.mxu1 %v1028_v40  ;;  %s1106_s19 = scalar_lea.vmem %s833_s3, 2048  ;;  %p1111_p3 = scmp.lt.s32.totalorder %s833_s3, %s833_s3 }
  0x35   :  { %987 = vmatprep.subr.bf16.mxu1 %v1029_v41  ;;  %p1107_p2 = scmp.ne.s32.totalorder %s833_s3, %s1106_s19  ;;  %p1112_p4 = scmp.lt.s32.totalorder %s1106_s19, %s1106_s19 }
  0x37   :  { %928 = vmatpush3.bf16.msra.mxu0 %v66_v12  ;;  %p1113_p5 = por %p1112_p4, %p1111_p3 }
  0x38   :  { %929 = vmatprep.subr.bf16.mxu0 %v67_v15 }
  0x39   :  { %p1114_p6 = pnand %p1113_p5, %p1107_p2 }
  0x3b   :  { %930 = vmatpush3.bf16.msra.mxu0 %v67_v15 }
  0x3c   :  { %931 = vmatprep.subr.bf16.mxu0 %v68_v18 }
  0x3f   :  { %932 = vmatpush3.bf16.msra.mxu0 %v68_v18 }
  0x40   :  { %933 = vmatprep.subr.bf16.mxu0 %v69_v21 }
  0x43   :  { %934 = vmatpush3.bf16.msra.mxu0 %v69_v21 }
  0x44   :  { %935 = vmatprep.subr.bf16.mxu0 %v70_v24 }
  0x47   :  { %936 = vmatpush3.bf16.msra.mxu0 %v70_v24 }
  0x4a   :  { %938 = vmatmul.mubr.bf16.vlgmr.msra.gmra.mrb[0].mxu0 %v1013_v25 }
  0x4b   :  { %941 = vmatprep.mubr.bf16.mxu0 %v1014_v26 }
  0x52   :  { %942 = vmatmul.mubr.bf16.gmra.mrb[4].mxu0 %v1015_v27 }
  0x53   :  { %945 = vmatprep.mubr.bf16.mxu0 %v1016_v28 }
  0x5a   :  { %946 = vmatmul.mubr.bf16.gmra.mrb[8].mxu0 %v1017_v29 }
  0x5b   :  { %949 = vmatprep.mubr.bf16.mxu0 %v1018_v30 }
  0x62   :  { %950 = vmatmul.mubr.bf16.gmra.mrb[12].mxu0 %v1019_v31 }
  0x63   :  { %953 = vmatprep.mubr.bf16.mxu0 %v1020_v32 }
  0x6a   :  { %954 = vmatmul.mubr.bf16.gmra.mrb[16].mxu0 %v1021_v33 }
  0x6b   :  { %957 = vmatprep.mubr.bf16.mxu0 %v1022_v34 }
  0x72   :  { %958 = vmatmul.mubr.bf16.gmra.mrb[20].mxu0 %v1023_v35 }
  0x73   :  { %961 = vmatprep.mubr.bf16.mxu0 %v1024_v36 }
  0x7a   :  { %962 = vmatmul.mubr.bf16.gmra.mrb[24].mxu0 %v1025_v37 }
  0x7b   :  { %965 = vmatprep.mubr.bf16.mxu0 %v1026_v38 }
  0x82   :  { %966 = vmatmul.mubr.bf16.gmra.mrb[28].mxu0 %v1027_v39 }
 0x11d   :  { %v939_v42 = vpop.f32.mrb[0].mxu0 }
 0x11e   :  { %v233_v43 = vpop.f32.mrb[1].mxu0 }
 0x11f   :  { %v940_v44 = vpop.f32.mrb[2].mxu0 }
 0x120   :  { %v361_v45 = vpack.c.bf16 %v940_v44, %v939_v42  ;;  %v236_v46 = vpop.f32.mrb[3].mxu0 }
 0x121   :  { %v360_v47 = vpack.c.bf16 %v236_v46, %v233_v43 }
 0x123   :  { %971 = vmatprep.mubr.msk.bf16.mxu1 %vm384_vm0, %v360_v47 }
 0x124   :  { %972 = vmatmul.mubr.msk.bf16.vlgmr.msra.gmra.mrb[0].mxu1 %vm384_vm0, %v361_v45 }
 0x125   :  { %988 = vmatpush3.bf16.msra.mxu1 %v1029_v41  ;;  %v943_v48 = vpop.f32.mrb[4].mxu0 }
 0x126   :  { %v249_v49 = vpop.f32.mrb[5].mxu0 }
 0x127   :  { %v944_v50 = vpop.f32.mrb[6].mxu0 }
 0x128   :  { %v363_v51 = vpack.c.bf16 %v944_v50, %v943_v48  ;;  %v252_v52 = vpop.f32.mrb[7].mxu0 }
 0x129   :  { %v362_v53 = vpack.c.bf16 %v252_v52, %v249_v49 }
 0x12b   :  { %975 = vmatprep.mubr.msk.bf16.mxu1 %vm384_vm0, %v362_v53 }
 0x12c   :  { %976 = vmatmul.mubr.msk.bf16.gmra.mrb[4].mxu1 %vm384_vm0, %v363_v51 }
 0x12d   :  { %v947_v54 = vpop.f32.mrb[8].mxu0 }
 0x12e   :  { %v265_v55 = vpop.f32.mrb[9].mxu0 }
 0x12f   :  { %v948_v56 = vpop.f32.mrb[10].mxu0 }
 0x130   :  { %v365_v57 = vpack.c.bf16 %v948_v56, %v947_v54  ;;  %v268_v58 = vpop.f32.mrb[11].mxu0 }
 0x131   :  { %v364_v59 = vpack.c.bf16 %v268_v58, %v265_v55 }
 0x133   :  { %979 = vmatprep.mubr.msk.bf16.mxu1 %vm384_vm0, %v364_v59 }
 0x134   :  { %980 = vmatmul.mubr.msk.bf16.gmra.mrb[8].mxu1 %vm384_vm0, %v365_v57 }
 0x135   :  { %v951_v60 = vpop.f32.mrb[12].mxu0 }
 0x136   :  { %v281_v61 = vpop.f32.mrb[13].mxu0 }
 0x137   :  { %v952_v62 = vpop.f32.mrb[14].mxu0 }
 0x138   :  { %v367_v63 = vpack.c.bf16 %v952_v62, %v951_v60  ;;  %v284_v0 = vpop.f32.mrb[15].mxu0 }
 0x139   :  { %v366_v1 = vpack.c.bf16 %v284_v0, %v281_v61 }
 0x13b   :  { %983 = vmatprep.mubr.msk.bf16.mxu1 %vm384_vm0, %v366_v1 }
 0x13c   :  { %984 = vmatmul.mubr.msk.bf16.gmra.mrb[12].mxu1 %vm384_vm0, %v367_v63 }
 0x13d   :  { %v955_v2 = vpop.f32.mrb[16].mxu0 }
 0x13e   :  { %v297_v3 = vpop.f32.mrb[17].mxu0 }
 0x13f   :  { %v956_v4 = vpop.f32.mrb[18].mxu0 }
 0x140   :  { %v369_v5 = vpack.c.bf16 %v956_v4, %v955_v2  ;;  %v300_v6 = vpop.f32.mrb[19].mxu0 }
 0x141   :  { %v368_v7 = vpack.c.bf16 %v300_v6, %v297_v3 }
 0x143   :  { %989 = vmatprep.mubr.msk.bf16.mxu1 %vm384_vm0, %v368_v7 }
 0x144   :  { %990 = vmatmul.mubr.msk.bf16.vlgmr.msra.gmra.mrb[16].mxu1 %vm384_vm0, %v369_v5 }
 0x145   :  { %v959_v8 = vpop.f32.mrb[20].mxu0 }
 0x146   :  { %v313_v9 = vpop.f32.mrb[21].mxu0 }
 0x147   :  { %v960_v10 = vpop.f32.mrb[22].mxu0 }
 0x148   :  { %v371_v11 = vpack.c.bf16 %v960_v10, %v959_v8  ;;  %v316_v12 = vpop.f32.mrb[23].mxu0 }
 0x149   :  { %v370_v13 = vpack.c.bf16 %v316_v12, %v313_v9 }
 0x14b   :  { %993 = vmatprep.mubr.msk.bf16.mxu1 %vm384_vm0, %v370_v13 }
 0x14c   :  { %994 = vmatmul.mubr.msk.bf16.gmra.mrb[20].mxu1 %vm384_vm0, %v371_v11 }
 0x14d   :  { %v963_v14 = vpop.f32.mrb[24].mxu0 }
 0x14e   :  { %v329_v15 = vpop.f32.mrb[25].mxu0 }
 0x14f   :  { %v964_v16 = vpop.f32.mrb[26].mxu0 }
 0x150   :  { %v373_v17 = vpack.c.bf16 %v964_v16, %v963_v14  ;;  %v332_v18 = vpop.f32.mrb[27].mxu0 }
 0x151   :  { %v372_v19 = vpack.c.bf16 %v332_v18, %v329_v15 }
 0x153   :  { %997 = vmatprep.mubr.msk.bf16.mxu1 %vm384_vm0, %v372_v19 }
 0x154   :  { %998 = vmatmul.mubr.msk.bf16.gmra.mrb[24].mxu1 %vm384_vm0, %v373_v17 }
 0x155   :  { %v967_v20 = vpop.f32.mrb[28].mxu0 }
 0x156   :  { %v345_v21 = vpop.f32.mrb[29].mxu0 }
 0x157   :  { %v968_v22 = vpop.f32.mrb[30].mxu0 }
 0x158   :  { %v375_v23 = vpack.c.bf16 %v968_v22, %v967_v20  ;;  %v348_v24 = vpop.f32.mrb[31].mxu0 }
 0x159   :  { %v374_v25 = vpack.c.bf16 %v348_v24, %v345_v21 }
 0x15b   :  { %1001 = vmatprep.mubr.msk.bf16.mxu1 %vm384_vm0, %v374_v25 }
 0x15c   :  { %1002 = vmatmul.mubr.msk.bf16.gmra.mrb[28].mxu1 %vm384_vm0, %v375_v23 }
 0x1f7   :  { %v973_v26 = vpop.f32.mrb[0].mxu1 }
 0x1f8   :  { %v443_v27 = vpop.f32.mrb[1].mxu1  ;;  %v637_v43 = vmul.f32 %v973_v26, %v973_v26 }
 0x1f9   :  { %v974_v28 = vpop.f32.mrb[2].mxu1  ;;  %v635_v46 = vmul.f32 %v443_v27, %v443_v27 }
 0x1fa   :  { %v446_v29 = vpop.f32.mrb[3].mxu1  ;;  %v638_v49 = vmul.f32 %v974_v28, %v974_v28 }
 0x1fb   :  { %v636_v53 = vmul.f32 %v446_v29, %v446_v29 }
 0x1ff   :  { %v977_v30 = vpop.f32.mrb[4].mxu1 }
 0x200   :  { %v459_v31 = vpop.f32.mrb[5].mxu1  ;;  %v641_v3 = vmul.f32 %v977_v30, %v977_v30 }
 0x201   :  { %v978_v32 = vpop.f32.mrb[6].mxu1  ;;  %v639_v4 = vmul.f32 %v459_v31, %v459_v31 }
 0x202   :  { %v462_v33 = vpop.f32.mrb[7].mxu1  ;;  %v642_v6 = vmul.f32 %v978_v32, %v978_v32 }
 0x203   :  { %v640_v7 = vmul.f32 %v462_v33, %v462_v33 }
 0x207   :  { %v981_v34 = vpop.f32.mrb[8].mxu1 }
 0x208   :  { %v475_v35 = vpop.f32.mrb[9].mxu1  ;;  %v645_v12 = vmul.f32 %v981_v34, %v981_v34 }
 0x209   :  { %v982_v36 = vpop.f32.mrb[10].mxu1  ;;  %v643_v13 = vmul.f32 %v475_v35, %v475_v35 }
 0x20a   :  { %v478_v37 = vpop.f32.mrb[11].mxu1  ;;  %v646_v14 = vmul.f32 %v982_v36, %v982_v36 }
 0x20b   :  { %v1224_v15 = vmul.f32 %v478_v37, %v478_v37 }
 0x20f   :  { %v985_v38 = vpop.f32.mrb[12].mxu1 }
 0x210   :  { %v491_v39 = vpop.f32.mrb[13].mxu1  ;;  %v1230_v20 = vmul.f32 %v985_v38, %v985_v38 }
 0x211   :  { %v986_v40 = vpop.f32.mrb[14].mxu1  ;;  %v1232_v21 = vmul.f32 %v491_v39, %v491_v39 }
 0x212   :  { %v494_v41 = vpop.f32.mrb[15].mxu1  ;;  %v1234_v22 = vmul.f32 %v986_v40, %v986_v40 }
 0x213   :  { %v1236_v23 = vmul.f32 %v494_v41, %v494_v41 }
 0x217   :  { %v991_v42 = vpop.f32.mrb[16].mxu1 }
 0x218   :  { %v653_v44 = vmul.f32 %v991_v42, %v991_v42  ;;  %v572_v45 = vpop.f32.mrb[17].mxu1 }
 0x219   :  { %v651_v47 = vmul.f32 %v572_v45, %v572_v45  ;;  %v992_v48 = vpop.f32.mrb[18].mxu1 }
 0x21a   :  { %v669_v50 = vadd.f32 %v653_v44, %v637_v43  ;;  %v654_v51 = vmul.f32 %v992_v48, %v992_v48  ;;  %v575_v52 = vpop.f32.mrb[19].mxu1 }
 0x21b   :  { %v667_v54 = vadd.f32 %v651_v47, %v635_v46  ;;  %v652_v55 = vmul.f32 %v575_v52, %v575_v52 }
 0x21c   :  { %v685_v56 = vadd.f32 0.0001, %v669_v50  ;;  %v670_v57 = vadd.f32 %v654_v51, %v638_v49 }
 0x21d   :  { %v1215_v58 = vadd.f32 0.0001, %v667_v54  ;;  %v668_v59 = vadd.f32 %v652_v55, %v636_v53 }
 0x21e   :  { %1030 = vrsqrt.f32 %v685_v56  ;;  %v1218_v61 = vadd.f32 0.0001, %v670_v57  ;;  %vm715_vm1 = vcmp.eq.f32.partialorder %v685_v56, inf  ;;  %vm717_vm2 = vcmp.eq.f32.partialorder %v685_v56, 0.0 }
 0x21f   :  { %1032 = vrsqrt.f32 %v1215_v58  ;;  %v995_v60 = vpop.f32.mrb[20].mxu1  ;;  %v1220_v62 = vadd.f32 0.0001, %v668_v59  ;;  %v718_v26 = vand.u32 2147483648, %v685_v56  ;;  %vm701_vm3 = vcmp.eq.f32.partialorder %v1215_v58, inf }
 0x220   :  { %v657_v63 = vmul.f32 %v995_v60, %v995_v60  ;;  %v588_v0 = vpop.f32.mrb[21].mxu1  ;;  %1034 = vrsqrt.f32 %v1218_v61  ;;  %vm703_vm4 = vcmp.eq.f32.partialorder %v1215_v58, 0.0  ;;  %v704_v32 = vand.u32 2147483648, %v1215_v58 }
 0x221   :  { %v655_v1 = vmul.f32 %v588_v0, %v588_v0  ;;  %v996_v2 = vpop.f32.mrb[22].mxu1  ;;  %1036 = vrsqrt.f32 %v1220_v62  ;;  %vm722_vm5 = vcmp.eq.f32.partialorder %v1218_v61, inf  ;;  %vm724_vm6 = vcmp.eq.f32.partialorder %v1218_v61, 0.0 }
 0x222   :  { %v591_v5 = vpop.f32.mrb[23].mxu1  ;;  %v673_v8 = vadd.f32 %v657_v63, %v641_v3  ;;  %v658_v10 = vmul.f32 %v996_v2, %v996_v2  ;;  %v725_v46 = vand.u32 2147483648, %v1218_v61  ;;  %vm708_vm7 = vcmp.eq.f32.partialorder %v1220_v62, inf }
 0x223   :  { %v671_v9 = vadd.f32 %v655_v1, %v639_v4  ;;  %v656_v11 = vmul.f32 %v591_v5, %v591_v5  ;;  %vm710_vm8 = vcmp.eq.f32.partialorder %v1220_v62, 0.0  ;;  %v711_v49 = vand.u32 2147483648, %v1220_v62 }
 0x224   :  { %v1226_v16 = vadd.f32 0.0001, %v673_v8  ;;  %v674_v18 = vadd.f32 %v658_v10, %v642_v6 }
 0x225   :  { %v1228_v17 = vadd.f32 0.0001, %v671_v9  ;;  %v672_v19 = vadd.f32 %v656_v11, %v640_v7 }
 0x226   :  { %1038 = vrsqrt.f32 %v1226_v16  ;;  %v1244_v33 = vadd.f32 0.0001, %v674_v18  ;;  %vm743_vm9 = vcmp.eq.f32.partialorder %v1226_v16, inf  ;;  %vm745_vm10 = vcmp.eq.f32.partialorder %v1226_v16, 0.0 }
 0x227   :  { %v999_v24 = vpop.f32.mrb[24].mxu1  ;;  %1040 = vrsqrt.f32 %v1228_v17  ;;  %v1246_v34 = vadd.f32 0.0001, %v672_v19  ;;  %vm729_vm11 = vcmp.eq.f32.partialorder %v1228_v17, inf  ;;  %vm731_vm12 = vcmp.eq.f32.partialorder %v1228_v17, 0.0 }
 0x228   :  { %v1031_v25 = vpop.eup %1030  ;;  %v604_v27 = vpop.f32.mrb[25].mxu1  ;;  %v661_v37 = vmul.f32 %v999_v24, %v999_v24  ;;  %1042 = vrsqrt.f32 %v1244_v33  ;;  %v732_v10 = vand.u32 2147483648, %v1228_v17  ;;  %vm750_vm13 = vcmp.eq.f32.partialorder %v1244_v33, inf }
 0x229   :  { %v1033_v28 = vpop.eup %1032  ;;  %v714_v29 = vmul.f32 %v1031_v25, %v685_v56  ;;  %v1000_v30 = vpop.f32.mrb[26].mxu1  ;;  %v659_v38 = vmul.f32 %v604_v27, %v604_v27  ;;  %1044 = vrsqrt.f32 %v1246_v34  ;;  %vm752_vm14 = vcmp.eq.f32.partialorder %v1244_v33, 0.0 }
 0x22a   :  { %v700_v31 = vmul.f32 %v1033_v28, %v1215_v58  ;;  %v607_v35 = vpop.f32.mrb[27].mxu1  ;;  %v1035_v39 = vpop.eup %1034  ;;  %v662_v42 = vmul.f32 %v1000_v30, %v1000_v30  ;;  %v677_v50 = vadd.f32 %v661_v37, %v645_v12  ;;  %v753_v18 = vand.u32 2147483648, %v1244_v33 }
 0x22b   :  { %v716_v36 = vsel %vm715_vm1, %v685_v56, %v714_v29  ;;  %v1037_v43 = vpop.eup %1036  ;;  %v721_v45 = vmul.f32 %v1035_v39, %v1218_v61  ;;  %v675_v51 = vadd.f32 %v659_v38, %v643_v13  ;;  %v660_v56 = vmul.f32 %v607_v35, %v607_v35 }
 0x22c   :  { %v719_v40 = vsel %vm717_vm2, %v718_v26, %v716_v36  ;;  %v702_v41 = vsel %vm701_vm3, %v1215_v58, %v700_v31  ;;  %v707_v47 = vmul.f32 %v1037_v43, %v1220_v62  ;;  %v678_v55 = vadd.f32 %v662_v42, %v646_v14 }
 0x22d   :  { %813 = vst.msk [vmem:[#allocation7 + $0x10] sm:$0xff] %vm384_vm0, %v719_v40  ;;  %v705_v44 = vsel %vm703_vm4, %v704_v32, %v702_v41  ;;  %v723_v48 = vsel %vm722_vm5, %v1218_v61, %v721_v45  ;;  %v1271_v59 = vadd.f32 0.0001, %v677_v50  ;;  %v1273_v60 = vadd.f32 0.0001, %v675_v51 }
 0x22e   :  { %811 = vst.msk [vmem:[#allocation7] sm:$0xff] %vm384_vm0, %v705_v44  ;;  %v726_v53 = vsel %vm724_vm6, %v725_v46, %v723_v48  ;;  %v709_v54 = vsel %vm708_vm7, %v1220_v62, %v707_v47  ;;  %v746_v62 = vand.u32 2147483648, %v1226_v16  ;;  %v1278_v0 = vadd.f32 0.0001, %v678_v55 }
 0x22f   :  { %v1003_v52 = vpop.f32.mrb[28].mxu1  ;;  %814 = vst.msk [vmem:[#allocation7 + $0x18] sm:$0xff] %vm384_vm0, %v726_v53  ;;  %v712_v58 = vsel %vm710_vm8, %v711_v49, %v709_v54  ;;  %v676_v1 = vadd.f32 %v660_v56, %v1224_v15  ;;  %1046 = vrsqrt.f32 %v1271_v59  ;;  %vm736_vm15 = vcmp.eq.f32.partialorder %v1246_v34, inf }
 0x230   :  { %v620_v57 = vpop.f32.mrb[29].mxu1  ;;  %v1039_v63 = vpop.eup %1038  ;;  %812 = vst.msk [vmem:[#allocation7 + $0x8] sm:$0xff] %vm384_vm0, %v712_v58  ;;  %v665_v5 = vmul.f32 %v1003_v52, %v1003_v52  ;;  %1048 = vrsqrt.f32 %v1273_v60  ;;  %vm738_vm1 = vcmp.eq.f32.partialorder %v1246_v34, 0.0  ;;  %v739_v30 = vand.u32 2147483648, %v1246_v34 }
 0x231   :  { %v1004_v61 = vpop.f32.mrb[30].mxu1  ;;  %v1041_v3 = vpop.eup %1040  ;;  %v742_v4 = vmul.f32 %v1039_v63, %v1226_v16  ;;  %v663_v7 = vmul.f32 %v620_v57, %v620_v57  ;;  %1050 = vrsqrt.f32 %v1278_v0  ;;  %v692_v19 = vadd.f32 0.0001, %v676_v1 }
 0x232   :  { %v623_v2 = vpop.f32.mrb[31].mxu1  ;;  %v728_v6 = vmul.f32 %v1041_v3, %v1228_v17  ;;  %v666_v8 = vmul.f32 %v1004_v61, %v1004_v61  ;;  %v1043_v11 = vpop.eup %1042  ;;  %vm771_vm2 = vcmp.eq.f32.partialorder %v1271_v59, inf  ;;  %vm773_vm3 = vcmp.eq.f32.partialorder %v1271_v59, 0.0 }
 0x233   :  { %v744_v9 = vsel %vm743_vm9, %v1226_v16, %v742_v4  ;;  %v749_v15 = vmul.f32 %v1043_v11, %v1244_v33  ;;  %v1045_v24 = vpop.eup %1044  ;;  %v681_v16 = vadd.f32 %v665_v5, %v1230_v20  ;;  %v679_v25 = vadd.f32 %v663_v7, %v1232_v21 }
 0x234   :  { %v747_v12 = vsel %vm745_vm10, %v746_v62, %v744_v9  ;;  %v730_v13 = vsel %vm729_vm11, %v1228_v17, %v728_v6  ;;  %v682_v17 = vadd.f32 %v666_v8, %v1234_v22  ;;  %v664_v26 = vmul.f32 %v623_v2, %v623_v2 }
 0x235   :  { %817 = vst.msk [vmem:[#allocation7 + $0x30] sm:$0xff] %vm384_vm0, %v747_v12  ;;  %v733_v14 = vsel %vm731_vm12, %v732_v10, %v730_v13  ;;  %v751_v27 = vsel %vm750_vm13, %v1244_v33, %v749_v15  ;;  %v735_v28 = vmul.f32 %v1045_v24, %v1246_v34  ;;  %1052 = vrsqrt.f32 %v692_v19 }
 0x236   :  { %815 = vst.msk [vmem:[#allocation7 + $0x20] sm:$0xff] %vm384_vm0, %v733_v14  ;;  %v754_v29 = vsel %vm752_vm14, %v753_v18, %v751_v27  ;;  %v697_v20 = vadd.f32 0.0001, %v681_v16  ;;  %v1313_v22 = vadd.f32 0.0001, %v679_v25  ;;  %v680_v32 = vadd.f32 %v664_v26, %v1236_v23 }
 0x237   :  { %818 = vst.msk [vmem:[#allocation7 + $0x38] sm:$0xff] %vm384_vm0, %v754_v29  ;;  %v737_v21 = vsel %vm736_vm15, %v1246_v34, %v735_v28  ;;  %v1315_v31 = vadd.f32 0.0001, %v682_v17  ;;  %v774_v34 = vand.u32 2147483648, %v1271_v59  ;;  %vm757_vm4 = vcmp.eq.f32.partialorder %v1273_v60, inf }
 0x238   :  { %v740_v35 = vsel %vm738_vm1, %v739_v30, %v737_v21  ;;  %1054 = vrsqrt.f32 %v697_v20  ;;  %vm759_vm5 = vcmp.eq.f32.partialorder %v1273_v60, 0.0  ;;  %v696_v39 = vadd.f32 0.0001, %v680_v32 }
 0x239   :  { %v1047_v36 = vpop.eup %1046  ;;  %816 = vst.msk [vmem:[#allocation7 + $0x28] sm:$0xff] %vm384_vm0, %v740_v35  ;;  %1056 = vrsqrt.f32 %v1313_v22  ;;  %v760_v41 = vand.u32 2147483648, %v1273_v60  ;;  %vm778_vm6 = vcmp.eq.f32.partialorder %v1278_v0, inf  ;;  %v781_v45 = vand.u32 2147483648, %v1278_v0 }
 0x23a   :  { %v1049_v33 = vpop.eup %1048  ;;  %v770_v37 = vmul.f32 %v1047_v36, %v1271_v59  ;;  %1058 = vrsqrt.f32 %v1315_v31  ;;  %vm780_vm7 = vcmp.eq.f32.partialorder %v1278_v0, 0.0  ;;  %vm764_vm8 = vcmp.eq.f32.partialorder %v692_v19, inf }
 0x23b   :  { %v1051_v38 = vpop.eup %1050  ;;  %v756_v23 = vmul.f32 %v1049_v33, %v1273_v60  ;;  %1060 = vrsqrt.f32 %v696_v39  ;;  %v767_v51 = vand.u32 2147483648, %v692_v19  ;;  %vm766_vm9 = vcmp.eq.f32.partialorder %v692_v19, 0.0 }
 0x23c   :  { %v772_v40 = vsel %vm771_vm2, %v1271_v59, %v770_v37  ;;  %v777_v42 = vmul.f32 %v1051_v38, %v1278_v0  ;;  %vm799_vm10 = vcmp.eq.f32.partialorder %v697_v20, inf  ;;  %vm801_vm11 = vcmp.eq.f32.partialorder %v697_v20, 0.0 }
 0x23d   :  { %v775_v43 = vsel %vm773_vm3, %v774_v34, %v772_v40  ;;  %v758_v44 = vsel %vm757_vm4, %v1273_v60, %v756_v23  ;;  %v802_v58 = vand.u32 2147483648, %v697_v20  ;;  %vm785_vm12 = vcmp.eq.f32.partialorder %v1313_v22, inf }
 0x23e   :  { %821 = vst.msk [vmem:[#allocation7 + $0x50] sm:$0xff] %vm384_vm0, %v775_v43  ;;  %v761_v46 = vsel %vm759_vm5, %v760_v41, %v758_v44  ;;  %v779_v47 = vsel %vm778_vm6, %v1278_v0, %v777_v42  ;;  %vm787_vm13 = vcmp.eq.f32.partialorder %v1313_v22, 0.0  ;;  %v788_v61 = vand.u32 2147483648, %v1313_v22 }
 0x23f   :  { %v1053_v48 = vpop.eup %1052  ;;  %819 = vst.msk [vmem:[#allocation7 + $0x40] sm:$0xff] %vm384_vm0, %v761_v46  ;;  %v782_v49 = vsel %vm780_vm7, %v781_v45, %v779_v47  ;;  %vm806_vm14 = vcmp.eq.f32.partialorder %v1315_v31, inf  ;;  %v809_v1 = vand.u32 2147483648, %v1315_v31  ;;  %vm808_vm15 = vcmp.eq.f32.partialorder %v1315_v31, 0.0 }
 0x240   :  { %822 = vst.msk [vmem:[#allocation7 + $0x58] sm:$0xff] %vm384_vm0, %v782_v49  ;;  %v763_v50 = vmul.f32 %v1053_v48, %v692_v19  ;;  %vm792_vm1 = vcmp.eq.f32.partialorder %v696_v39, inf  ;;  %v795_v7 = vand.u32 2147483648, %v696_v39  ;;  %vm794_vm2 = vcmp.eq.f32.partialorder %v696_v39, 0.0 }
 0x242   :  { %v1055_v52 = vpop.eup %1054  ;;  %v765_v53 = vsel %vm764_vm8, %v692_v19, %v763_v50 }
 0x243   :  { %v1057_v54 = vpop.eup %1056  ;;  %v768_v55 = vsel %vm766_vm9, %v767_v51, %v765_v53  ;;  %v798_v56 = vmul.f32 %v1055_v52, %v697_v20 }
 0x244   :  { %v1059_v57 = vpop.eup %1058  ;;  %820 = vst.msk [vmem:[#allocation7 + $0x48] sm:$0xff] %vm384_vm0, %v768_v55  ;;  %v784_v59 = vmul.f32 %v1057_v54, %v1313_v22 }
 0x245   :  { %v800_v60 = vsel %vm799_vm10, %v697_v20, %v798_v56  ;;  %v805_v63 = vmul.f32 %v1059_v57, %v1315_v31  ;;  %v1061_v2 = vpop.eup %1060 }
 0x246   :  { %v803_v62 = vsel %vm801_vm11, %v802_v58, %v800_v60  ;;  %v786_v0 = vsel %vm785_vm12, %v1313_v22, %v784_v59  ;;  %v791_v6 = vmul.f32 %v1061_v2, %v696_v39 }
 0x247   :  { %825 = vst.msk [vmem:[#allocation7 + $0x70] sm:$0xff] %vm384_vm0, %v803_v62  ;;  %v789_v3 = vsel %vm787_vm13, %v788_v61, %v786_v0  ;;  %v807_v4 = vsel %vm806_vm14, %v1315_v31, %v805_v63 }
 0x248   :  { %823 = vst.msk [vmem:[#allocation7 + $0x60] sm:$0xff] %vm384_vm0, %v789_v3  ;;  %v810_v5 = vsel %vm808_vm15, %v809_v1, %v807_v4  ;;  %v793_v8 = vsel %vm792_vm1, %v696_v39, %v791_v6 }
 0x249   :  { %826 = vst.msk [vmem:[#allocation7 + $0x78] sm:$0xff] %vm384_vm0, %v810_v5  ;;  %v796_v9 = vsel %vm794_vm2, %v795_v7, %v793_v8 }
 0x24a   :  { %824 = vst.msk [vmem:[#allocation7 + $0x68] sm:$0xff] %vm384_vm0, %v796_v9 }
 0x24b   :  { %1117 = shalt.err (!%p1114_p6)
}
 0x24c   :  { %s1118_s22 = scalar_lea.hbm %s1373_s4, 2048 }
 0x24d   :  { %p1119_p7 = scmp.ne.s32.totalorder %s1373_s4, %s1118_s22  ;;  %p1122_p8 = scmp.lt.u32.totalorder %s1118_s22, %s1373_s4 }
 0x24f   :  { %p1124_p9 = pnand %p1122_p8, %p1119_p7 }
 0x251   :  { %1127 = shalt.err (!%p1124_p9)
}
 0x252   :  { %838 = dma.vmem_to_hbm [thread:$0]  %s833_s3, 2048, %s1373_s4, [#allocation4], %s1135_s25, %s1135_s25, %s1136_s26  }
 0x253   :  { %1132 = dma.done.wait [#allocation4], 2048  }
 0x254   :  { %1133 = vsyncadd [#allocation4], 4294965248 }
 0x255   :  { %842 = vsyncpa [#allocation3], 1 }
 0x256   :  { %843 = vsyncpa [#allocation6], 1 }
 0x257   :  { %844 = vsyncpa [#allocation4], 1 }

</bundles_post_ra>
